<compile_context>
chip_gen: v5e
topology: v5e:2x2
jax: 0.10.0
libtpu: 0.0.40
codegen_flags: <defaults>
</compile_context>

<pallas_src>
import math
from functools import partial

import jax
import jax.numpy as jnp
from jax import lax
from jax.experimental import pallas as pl
from jax.experimental.pallas import tpu as pltpu

_LANE = 128
_MAX_LANE_DENSE_COLS = 32768


def _vmem_capacity_bytes():
    """Per-core VMEM capacity; conservative 64 MiB fallback (v7x-sized)."""
    try:
        cap = int(pltpu.get_tpu_info().vmem_capacity_bytes)
        return min(max(cap, 16 * 1024 * 1024), 128 * 1024 * 1024)
    except Exception:
        return 64 * 1024 * 1024


def _choose_layout(n, f):
    """Lane-dense (rows, cols, repeat) layout when the shapes allow it."""
    cols = math.lcm(f, _LANE)
    if (n * f) % cols == 0 and cols <= _MAX_LANE_DENSE_COLS:
        return (n * f) // cols, cols, cols // f
    # Fallback: native (N, F), zero host-side copies. If F % 128 != 0 the last
    # vreg per row is lane-masked; we accept that rather than paying two extra
    # whole-array HBM round trips for a pad + un-pad of a memory-bound kernel.
    return n, f, 1


def _choose_tile_rows(rows, cols, sub, target_bytes):
    """Row-tile size: multiple of the dtype sublane, ~target_bytes, <= rows."""
    bytes_per_row = cols * 4                       # budget in f32 terms
    max_rows = max(sub, (target_bytes // bytes_per_row) // sub * sub)
    rows_up = pl.cdiv(rows, sub) * sub
    return int(min(max_rows, rows_up))


# ----------------------------------------------------------------------------
# Fused fast path: whole array resident in VMEM, single pallas_call (no grid).
# ----------------------------------------------------------------------------
def _fused_kernel(x_ref, w_ref, b_ref, o_ref, *, inv_n, inv_nm1, eps):
    x = x_ref[...].astype(jnp.float32)
    mean = jnp.sum(x) * inv_n
    d = x - mean                                  # centered -> no cancellation
    var = jnp.sum(d * d) * inv_nm1
    scale = w_ref[...] * lax.rsqrt(var + eps)     # (1, cols)
    o_ref[...] = (d * scale + b_ref[...]).astype(o_ref.dtype)


# ----------------------------------------------------------------------------
# Two-pass path (large arrays).
# Pass 1: per-part column sums / sums-of-squares (accumulated in f32 scratch,
#         ragged/duplicate tiles masked, written once per part).
# ----------------------------------------------------------------------------
def _stats_kernel(x_ref, sum_ref, sq_ref, acc_s, acc_q, *,
                  rows, tile_rows, tiles_per_part):
    p = pl.program_id(0)
    t = pl.program_id(1)

    @pl.when(t == 0)
    def _():
        acc_s[...] = jnp.zeros_like(acc_s)
        acc_q[...] = jnp.zeros_like(acc_q)

    row0 = (p * tiles_per_part + t) * tile_rows   # logical first row of tile

    @pl.when(row0 + tile_rows <= rows)            # fully in-bounds: no masking
    def _():
        x = x_ref[...].astype(jnp.float32)
        acc_s[...] += jnp.sum(x, axis=0, keepdims=True)
        acc_q[...] += jnp.sum(x * x, axis=0, keepdims=True)

    @pl.when(row0 + tile_rows > rows)             # ragged / duplicate tile
    def _():
        x = x_ref[...].astype(jnp.float32)
        rid = row0 + lax.broadcasted_iota(jnp.int32, x.shape, 0)
        x = jnp.where(rid < rows, x, 0.0)         # zero OOB garbage rows
        acc_s[...] += jnp.sum(x, axis=0, keepdims=True)
        acc_q[...] += jnp.sum(x * x, axis=0, keepdims=True)

    @pl.when(t == tiles_per_part - 1)
    def _():
        # Broadcast the (1, cols) accumulator across the 8-row output block so
        # the store is full-width; the wrapper reads row 0 of each part block.
        sum_ref[...] = jnp.broadcast_to(acc_s[...], sum_ref.shape)
        sq_ref[...] = jnp.broadcast_to(acc_q[...], sq_ref.shape)


# Pass 2: out = x * scale + shift on independent row tiles (megacore parallel).
def _normalize_kernel(x_ref, scale_ref, shift_ref, o_ref):
    x = x_ref[...].astype(jnp.float32)
    o_ref[...] = (x * scale_ref[...] + shift_ref[...]).astype(o_ref.dtype)


def batchnorm1d_forward(x, weight, bias, eps=1e-5, *,
                        force_two_pass=False, tile_bytes=None):
    """x: (N, F); weight, bias: (F,). Returns (N, F) normalized output."""
    n, f = x.shape
    n_elems = n * f

    rows, cols, rep = _choose_layout(n, f)
    x2 = x.reshape(rows, cols)                                 # free reshape
    w_row = jnp.tile(weight.astype(jnp.float32), rep).reshape(1, cols)
    b_row = jnp.tile(bias.astype(jnp.float32), rep).reshape(1, cols)

    cap = _vmem_capacity_bytes()
    vmem_limit = (3 * cap) // 4            # ~96 MiB on v5e/v6e, ~48 MiB on v7x
    if tile_bytes is None:
        tile_bytes = cap // 16             # ~8 MiB on v5e/v6e, ~4 MiB on v7x

    inv_n = 1.0 / n_elems
    inv_nm1 = 1.0 / (n_elems - 1) if n_elems > 1 else float("nan")

    itemsize = jnp.dtype(x.dtype).itemsize
    io_bytes = rows * cols * itemsize                 # x block + out block
    f32_bytes = rows * cols * 4                       # in-kernel f32 temps
    fused_working_set = 2 * io_bytes + 2 * f32_bytes

    # ---- fused fast path: one HBM read + one HBM write ----------------------
    if (not force_two_pass) and fused_working_set <= (7 * cap) // 10:
        out2 = pl.pallas_call(
            partial(_fused_kernel, inv_n=inv_n, inv_nm1=inv_nm1, eps=eps),
            out_shape=jax.ShapeDtypeStruct((rows, cols), x.dtype),
            compiler_params=pltpu.CompilerParams(
                vmem_limit_bytes=(7 * cap) // 8),
        )(x2, w_row, b_row)
        return out2.reshape(n, f)

    # ---- two-pass path -------------------------------------------------------
    sub = max(8, 32 // itemsize)                      # f32:8, bf16:16, int8:32
    tile_rows = _choose_tile_rows(rows, cols, sub, tile_bytes)
    num_tiles = pl.cdiv(rows, tile_rows)
    num_parts = 2 if num_tiles >= 2 else 1            # core-split on v7x
    tiles_per_part = pl.cdiv(num_tiles, num_parts)

    def x_map(p_, t_):
        # Clamp so an overhanging part never indexes past the last block; the
        # duplicate tile's contribution is fully masked inside the kernel.
        return (jnp.minimum(p_ * tiles_per_part + t_, num_tiles - 1), 0)

    f32 = jnp.float32
    psum, psq = pl.pallas_call(
        partial(_stats_kernel, rows=rows, tile_rows=tile_rows,
                tiles_per_part=tiles_per_part),
        out_shape=(jax.ShapeDtypeStruct((num_parts * 8, cols), f32),
                   jax.ShapeDtypeStruct((num_parts * 8, cols), f32)),
        grid_spec=pltpu.PrefetchScalarGridSpec(
            num_scalar_prefetch=0,
            grid=(num_parts, tiles_per_part),
            in_specs=[pl.BlockSpec((tile_rows, cols), x_map)],
            out_specs=(pl.BlockSpec((8, cols), lambda p_, t_: (p_, 0)),
                       pl.BlockSpec((8, cols), lambda p_, t_: (p_, 0))),
            scratch_shapes=[pltpu.VMEM((1, cols), f32),
                            pltpu.VMEM((1, cols), f32)],
        ),
        compiler_params=pltpu.CompilerParams(
            dimension_semantics=("parallel", "arbitrary"),
            vmem_limit_bytes=vmem_limit),
    )(x2)

    # Tiny scalar finalize in plain JAX (a few hundred elements).
    # NOTE: one-pass sum/sumsq variance in f32; clamp guards tiny cancellation.
    s = jnp.sum(psum[0::8, :])
    ss = jnp.sum(psq[0::8, :])
    mean = s * inv_n
    var = jnp.maximum((ss - s * s * inv_n) * inv_nm1, 0.0)
    scale = w_row * lax.rsqrt(var + eps)              # (1, cols) f32
    shift = b_row - mean * scale                      # (1, cols) f32

    out2 = pl.pallas_call(
        _normalize_kernel,
        out_shape=jax.ShapeDtypeStruct((rows, cols), x.dtype),
        grid_spec=pltpu.PrefetchScalarGridSpec(
            num_scalar_prefetch=0,
            grid=(num_tiles,),
            in_specs=[pl.BlockSpec((tile_rows, cols), lambda i: (i, 0)),
                      pl.BlockSpec((1, cols), lambda i: (0, 0)),
                      pl.BlockSpec((1, cols), lambda i: (0, 0))],
            out_specs=pl.BlockSpec((tile_rows, cols), lambda i: (i, 0)),
        ),
        compiler_params=pltpu.CompilerParams(
            dimension_semantics=("parallel",),
            vmem_limit_bytes=vmem_limit),
    )(x2, scale, shift)
    return out2.reshape(n, f)


if __name__ == "__main__":
    EPS = 1e-5
    key = jax.random.PRNGKey(0)

    def reference(x, w, b):
        xf = x.astype(jnp.float32)
        m = jnp.mean(xf)
        v = jnp.sum((xf - m) ** 2) / (xf.size - 1)
        return (xf - m) / jnp.sqrt(v + EPS) * w + b

    def run_case(k, n, f, dtype, tol, **kw):
        kx, kw_, kb = jax.random.split(k, 3)
        x = jax.random.normal(kx, (n, f), dtype=jnp.float32).astype(dtype)
        w = 1.0 + 0.1 * jax.random.normal(kw_, (f,), dtype=jnp.float32)
        b = 0.1 * jax.random.normal(kb, (f,), dtype=jnp.float32)
        out = jax.block_until_ready(
            batchnorm1d_forward(x, w, b, eps=EPS, **kw))
        ref = reference(x, w, b)
        assert out.shape == (n, f) and out.dtype == dtype
        err = float(jnp.max(jnp.abs(out.astype(jnp.float32) - ref)))
        assert err <= tol, (n, f, str(dtype), kw, err)

    keys = jax.random.split(key, 5)
    # Primary small example (batch=16, num_features=32): fused one-call path.
    run_case(keys[0], 16, 32, jnp.float32, 1e-4)
    # Two-pass path: multi-tile grid, ragged last tile, 2-way part split.
    run_case(keys[1], 84, 32, jnp.float32, 1e-4,
             force_two_pass=True, tile_bytes=4096)
    # Fallback native layout (F not lane-friendly), fused path.
    run_case(keys[2], 7, 48, jnp.float32, 1e-4)
    # Fallback native layout through the two-pass path (partial single tile).
    run_case(keys[3], 7, 48, jnp.float32, 1e-4,
             force_two_pass=True, tile_bytes=4096)
    # bf16 input: dtype-aware (16-row) sublane tiling in the two-pass path.
    run_case(keys[4], 256, 32, jnp.bfloat16, 6e-2,
             force_two_pass=True, tile_bytes=8192)

    print("KERNEL_OK")
</pallas_src>

<mosaic_0001>
module attributes {stable_mosaic.version = 11 : i64} {
  func.func @_fused_kernel(%arg0: memref<4x128xf32, #tpu.memory_space<vmem>>, %arg1: memref<1x128xf32, #tpu.memory_space<vmem>>, %arg2: memref<1x128xf32, #tpu.memory_space<vmem>>, %arg3: memref<4x128xf32, #tpu.memory_space<vmem>>) attributes {dimension_semantics = [], scalar_prefetch = 0 : i64, scratch_operands = 0 : i64, tpu.core_type = #tpu.core_type<tc>} {
    %c0 = arith.constant 0 : index
    %c0_0 = arith.constant 0 : index
    %0 = vector.load %arg0[%c0, %c0_0] : memref<4x128xf32, #tpu.memory_space<vmem>>, vector<4x128xf32>
    %1 = vector.shape_cast %0 : vector<4x128xf32> to vector<1x4x128xf32>
    %cst = arith.constant dense<0.000000e+00> : vector<1xf32>
    %2 = vector.multi_reduction <add>, %1, %cst [1, 2] : vector<1x4x128xf32> to vector<1xf32>
    %3 = vector.shape_cast %2 : vector<1xf32> to vector<1x1x1xf32>
    %4 = vector.extract %3[0, 0, 0] : f32 from vector<1x1x1xf32>
    %cst_1 = arith.constant 0.001953125 : f32
    %5 = arith.mulf %4, %cst_1 : f32
    %6 = vector.broadcast %5 : f32 to vector<4x128xf32>
    %7 = arith.subf %0, %6 : vector<4x128xf32>
    %8 = arith.mulf %7, %7 : vector<4x128xf32>
    %9 = vector.shape_cast %8 : vector<4x128xf32> to vector<1x4x128xf32>
    %cst_2 = arith.constant dense<0.000000e+00> : vector<1xf32>
    %10 = vector.multi_reduction <add>, %9, %cst_2 [1, 2] : vector<1x4x128xf32> to vector<1xf32>
    %11 = vector.shape_cast %10 : vector<1xf32> to vector<1x1x1xf32>
    %12 = vector.extract %11[0, 0, 0] : f32 from vector<1x1x1xf32>
    %cst_3 = arith.constant 0.00195694715 : f32
    %13 = arith.mulf %12, %cst_3 : f32
    %c0_4 = arith.constant 0 : index
    %c0_5 = arith.constant 0 : index
    %14 = vector.load %arg1[%c0_4, %c0_5] : memref<1x128xf32, #tpu.memory_space<vmem>>, vector<1x128xf32>
    %cst_6 = arith.constant 9.99999974E-6 : f32
    %15 = arith.addf %13, %cst_6 : f32
    %16 = math.rsqrt %15 : f32
    %17 = vector.broadcast %16 : f32 to vector<1x128xf32>
    %18 = arith.mulf %14, %17 : vector<1x128xf32>
    %19 = vector.broadcast %18 : vector<1x128xf32> to vector<4x128xf32>
    %20 = arith.mulf %7, %19 : vector<4x128xf32>
    %c0_7 = arith.constant 0 : index
    %c0_8 = arith.constant 0 : index
    %21 = vector.load %arg2[%c0_7, %c0_8] : memref<1x128xf32, #tpu.memory_space<vmem>>, vector<1x128xf32>
    %22 = vector.broadcast %21 : vector<1x128xf32> to vector<4x128xf32>
    %23 = arith.addf %20, %22 : vector<4x128xf32>
    %c0_9 = arith.constant 0 : index
    %c0_10 = arith.constant 0 : index
    %24 = vector.load %arg3[%c0_9, %c0_10] : memref<4x128xf32, #tpu.memory_space<vmem>>, vector<4x128xf32>
    tpu.vector_store %arg3[%c0_9, %c0_10], %23 {strides = array<i32>} : memref<4x128xf32, #tpu.memory_space<vmem>>, vector<4x128xf32>,
    return
  }
}

</mosaic_0001>

<bundles_post_ra>
// kernel: tpu_custom_call.1
= control target key start
LH: loop header
LB: loop body
LE: loop exit
PB: predicated region body
PF: predicated region fallthrough
CT: control target
= control target key end

     0   :  { %8 = vsyncpa [#allocation3], 0  ;;  %s241_s0 = inlined_call_operand.hbm [shape: f32[4,128], index: 0, kind: input, shape index: {}]   ;;  %s242_s1 = inlined_call_operand.hbm [shape: f32[1,128], index: 1, kind: input, shape index: {}]   ;;  %s243_s2 = inlined_call_operand.vmem [shape: f32[1,128], index: 2, kind: input, shape index: {}]   ;;  %s244_s3 = inlined_call_operand.hbm [shape: f32[4,128], index: 3, kind: output, shape index: {}]  }
   0x1   :  { %9 = vsyncpa [#allocation6], 0 }
   0x2   :  { %10 = vsyncpa [#allocation4], 0  ;;  %s16_s14 = sshll.u32 %s241_s0, 4  ;;  %s204_s15 = smov [#allocation2]   ;;  %s17_s14 = int_to_ptr.hbm [resolvable:$true] %s16_s14 }
   0x3   :  { %s18_s16 = sshll.u32 %s204_s15, 4  ;;  %s27_s19 = sshll.u32 %s242_s1, 4  ;;  %s19_s16 = int_to_ptr.vmem [resolvable:$true] %s18_s16  ;;  %s28_s19 = int_to_ptr.hbm [resolvable:$true] %s27_s19 }
   0x4   :  { %21 = dma.hbm_to_vmem [thread:$0]  %s17_s14, 64, %s19_s16, [#allocation3]  }
   0x5   :  { %s205_s20 = smov [#allocation5]  }
   0x6   :  { %s29_s21 = sshll.u32 %s205_s20, 4  ;;  %s30_s21 = int_to_ptr.vmem [resolvable:$true] %s29_s21 }
   0x7   :  { %32 = dma.hbm_to_vmem [thread:$0]  %s28_s19, 16, %s30_s21, [#allocation6]  }
   0x8   :  { %198 = dma.done.wait [#allocation3], 64  }
   0x9   :  { %199 = vsyncadd [#allocation3], 4294967232 }
   0xa   :  { %200 = dma.done.wait [#allocation6], 16  }
   0xb   :  { %201 = vsyncadd [#allocation6], 4294967280  ;;  %vm44_vm0 = vcmask 1043456   ;;  %v43_v0 = vld [vmem:[#allocation2] sm:$0xf]  ;;  %s206_s28 = smov [#allocation7]  }
   0xc   :  { %v45_v1 = vsel %vm44_vm0, %v43_v0, 0.0  ;;  %v70_v28 = vld [vmem:[#allocation5] sm:$0x1]  ;;  %v123_v32 = vld [vmem:[%s243_s2] ss:$0 sm:$0xff]  ;;  %s101_s29 = sshll.u32 %s206_s28, 4  ;;  %s102_s29 = int_to_ptr.vmem [resolvable:$true] %s101_s29 }
   0xd   :  { %46 = vadd.xlane.f32.xlu0 %v45_v1  ;;  %s103_s5 = sshll.u32 %s244_s3, 4  ;;  %s104_s5 = int_to_ptr.hbm [resolvable:$true] %s103_s5 }
  0x80   :  { %v47_v2 = vpop.xlane.xlu0 %46 }
  0x81   :  { %v48_v3 = vrot.slane %v47_v2, 4 }
  0x83   :  { %v49_v4 = vadd.f32 %v48_v3, %v47_v2 }
  0x85   :  { %v50_v5 = vrot.slane %v49_v4, 2 }
  0x87   :  { %v51_v6 = vadd.f32 %v50_v5, %v49_v4 }
  0x89   :  { %v52_v7 = vrot.slane %v51_v6, 1 }
  0x8b   :  { %v53_v8 = vadd.f32 %v52_v7, %v51_v6 }
  0x8d   :  { %114 = vpush %v53_v8 }
  0xbe   :  { %s115_s0 = spop %114 }
  0xbf   :  { %s55_s1 = smul.f32 0.001953125, %s115_s0 }
  0xc1   :  { %v56_v9 = vstv %s55_s1 }
  0xc2   :  { %v57_v10 = vsub.f32 %v43_v0, %v56_v9 }
  0xc4   :  { %v58_v11 = vmul.f32 %v57_v10, %v57_v10 }
  0xc6   :  { %v59_v12 = vsel %vm44_vm0, %v58_v11, 0.0 }
  0xc7   :  { %60 = vadd.xlane.f32.xlu0 %v59_v12 }
 0x13a   :  { %v61_v13 = vpop.xlane.xlu0 %60 }
 0x13b   :  { %v62_v14 = vrot.slane %v61_v13, 4 }
 0x13d   :  { %v63_v15 = vadd.f32 %v62_v14, %v61_v13 }
 0x13f   :  { %v64_v16 = vrot.slane %v63_v15, 2 }
 0x141   :  { %v65_v17 = vadd.f32 %v64_v16, %v63_v15 }
 0x143   :  { %v66_v18 = vrot.slane %v65_v17, 1 }
 0x145   :  { %v67_v19 = vadd.f32 %v66_v18, %v65_v17 }
 0x147   :  { %116 = vpush %v67_v19 }
 0x178   :  { %s117_s22 = spop %116 }
 0x179   :  { %s69_s23 = smul.f32 0.0019569471, %s117_s22 }
 0x17b   :  { %s71_s24 = sadd.f32 1e-05, %s69_s23 }
 0x17d   :  { %v72_v20 = vstv %s71_s24 }
 0x17e   :  { %124 = vrsqrt.f32 %v72_v20  ;;  %vm79_vm2 = vweird.f32 %v72_v20 }
 0x184   :  { %v125_v21 = vpop.eup %124 }
 0x185   :  { %v74_v22 = vmul.f32 %v125_v21, %v72_v20  ;;  %vm80_vm1 = vweird.f32 %v125_v21 }
 0x186   :  { %vm81_vm3 = vmor %vm79_vm2, %vm80_vm1 }
 0x187   :  { %v75_v23 = vmul.f32 %v125_v21, %v74_v22 }
 0x189   :  { %v76_v24 = vmul.f32 0.5, %v75_v23 }
 0x18b   :  { %v77_v25 = vsub.f32 1.5, %v76_v24 }
 0x18d   :  { %v78_v26 = vmul.f32 %v125_v21, %v77_v25 }
 0x18f   :  { %v82_v27 = vsel %vm81_vm3, %v125_v21, %v78_v26 }
 0x190   :  { %118 = vpush %v82_v27 }
 0x1c1   :  { %s119_s25 = spop %118 }
 0x1c2   :  { %v84_v29 = vstv %s119_s25 }
 0x1c3   :  { %v85_v30 = vmul.f32 %v84_v29, %v70_v28 }
 0x1c5   :  { %v87_v31 = vperm.slane %v85_v30, 0 }
 0x1c7   :  { %v89_v33 = vmul.f32 %v87_v31, %v57_v10 }
 0x1c9   :  { %v94_v34 = vadd.f32 %v123_v32, %v89_v33 }
 0x1cb   :  { %95 = vst [vmem:[#allocation7] sm:$0xf] %v94_v34 }
 0x1cc   :  { %106 = dma.vmem_to_hbm [thread:$0]  %s102_s29, 64, %s104_s5, [#allocation4]  }
 0x1cd   :  { %202 = dma.done.wait [#allocation4], 64  }
 0x1ce   :  { %203 = vsyncadd [#allocation4], 4294967232 }
 0x1cf   :  { %111 = vsyncpa [#allocation3], 1 }
 0x1d0   :  { %112 = vsyncpa [#allocation6], 1 }
 0x1d1   :  { %113 = vsyncpa [#allocation4], 1 }

</bundles_post_ra>
